<compile_context>
chip_gen: v6e
topology: v6e:2x2x1
jax: 0.10.0
libtpu: 0.0.40
codegen_flags: <defaults>
</compile_context>

<pallas_src>
import math
import numpy as np

import jax
import jax.numpy as jnp
from jax.experimental import pallas as pl
from jax.experimental.pallas import tpu as pltpu

# ----------------------------- configuration -------------------------------
DIM = 3            # event dim
CONTEXT_DIM = 5
N_COMPONENTS = 4
N_LAYERS = 2       # number of (Linear+ELU+BN) blocks, matches the torch module
HIDDEN = 32
RANK = 2
BATCH = 8
BN_EPS = 1e-5
LOG2PI = math.log(2.0 * math.pi)

K, D, R = N_COMPONENTS, DIM, RANK
KD = K * D
SIZES = [K, D * K, (D + D * R) * K]
TOTAL = sum(SIZES)                     # = 52 for this config

# --------------------- padded, lane-aligned output layout -------------------
SLAB = 128                             # one 128-lane slab per logical quantity
N_SLABS = 3 + R                        # logits | (mean-data) | raw diag | W_r ...
OUT_PAD = SLAB * N_SLABS               # 640
LOGITS_OFF = 0
MEAN_OFF = 1 * SLAB
DIAG_OFF = 2 * SLAB


def _w_off(r):
    return (3 + r) * SLAB


# packed weight slab row layout (all blocks start at lane 0)
W0_ROW = 0                             # rows [0, CONTEXT_DIM)
W1_ROW = 8                             # rows [8, 8 + HIDDEN)
WAUG_ROW = 40                          # rows [40, 40 + HIDDEN + D + 1)
W_ROWS = 80

# packed bias-vector layout (128-lane-aligned slots)
B0_OFF = 0
B1_OFF = SLAB
VEC_LEN = 2 * SLAB


# ---------------------- torch-column -> padded-column map -------------------
# torch layout of the final Linear output:
#   [:, :K]                                -> mixture logits
#   [:, K + k*D + d]                       -> mean of component k, dim d
#   [:, K + K*D + k*(D+D*R) + d]           -> raw diag of component k, dim d
#   [:, K + K*D + k*(D+D*R) + D + d*R + r] -> cov_factor[k, d, r]
# padded kernel layout: one 128-lane slab each for
#   logits | mean slab (d-major, k-minor) | diag slab | W_{:,0} slab | W_{:,1} slab
def _build_colmap():
    cm = np.zeros(TOTAL, dtype=np.int32)
    for j in range(K):
        cm[j] = LOGITS_OFF + j
    for k in range(K):
        for d in range(D):
            cm[K + k * D + d] = MEAN_OFF + d * K + k
    cov_base = K + K * D
    per_k = D + D * R
    for k in range(K):
        for d in range(D):
            cm[cov_base + k * per_k + d] = DIAG_OFF + d * K + k
        for d in range(D):
            for r in range(R):
                cm[cov_base + k * per_k + D + d * R + r] = _w_off(r) + d * K + k
    assert len(set(cm.tolist())) == TOTAL
    return cm


_COLMAP = _build_colmap()


# --------------------- one-time parameter repacking --------------------------
def prepare_kernel_params(params):
    """Init/param-update-time repacking of torch-layout params (NOT per call)."""
    w0, b0, g0, be0, w1, b1, g1, be1, wo, bo = params

    # Fold the BatchNorm affine (gamma, beta) into the *following* Linear layer
    # (exact for the default gamma=1, beta=0).  The kernel only normalizes.
    w1f = g0.reshape(-1, 1) * w1
    b1f = b1 + be0 @ w1
    wof = g1.reshape(-1, 1) * wo
    bof = bo + be1 @ wo

    # Permute + pad the output layer into 128-lane-aligned slabs.
    colmap = jnp.asarray(_COLMAP)
    wo_pad = jnp.zeros((HIDDEN, OUT_PAD), jnp.float32).at[:, colmap].set(wof)
    bo_pad = jnp.zeros((OUT_PAD,), jnp.float32).at[colmap].set(bof.reshape(-1))

    # Augmented final matmul: kernel-side input is [h | data | 1].
    #   * data rows write -1 into the mean slab -> out[mean slab] = mean - data
    #   * ones row carries the bias through the MXU (no separate bias add)
    waug = jnp.zeros((HIDDEN + D + 1, OUT_PAD), jnp.float32)
    waug = waug.at[:HIDDEN, :].set(wo_pad)
    rows = HIDDEN + np.repeat(np.arange(D), K)
    cols = MEAN_OFF + np.repeat(np.arange(D), K) * K + np.tile(np.arange(K), D)
    waug = waug.at[rows, cols].set(-1.0)
    waug = waug.at[HIDDEN + D, :].set(bo_pad)

    # Pack all three weight matrices into one (80, 640) slab, each block at
    # lane offset 0 and a sublane-aligned row offset.
    wpack = jnp.zeros((W_ROWS, OUT_PAD), jnp.float32)
    wpack = wpack.at[W0_ROW:W0_ROW + CONTEXT_DIM, :HIDDEN].set(w0)
    wpack = wpack.at[W1_ROW:W1_ROW + HIDDEN, :HIDDEN].set(w1f)
    wpack = wpack.at[WAUG_ROW:WAUG_ROW + HIDDEN + D + 1, :].set(waug)

    # Pack the two remaining bias vectors into one array (128-aligned slots).
    vec = jnp.zeros((1, VEC_LEN), jnp.float32)
    vec = vec.at[0, B0_OFF:B0_OFF + HIDDEN].set(b0.reshape(-1))
    vec = vec.at[0, B1_OFF:B1_OFF + HIDDEN].set(b1f.reshape(-1))
    return wpack, vec


# ------------------------------ kernel helpers ------------------------------
def _elu(x):
    # torch F.ELU (alpha=1): x if x > 0 else exp(x) - 1.  The exp branch is
    # selected away for x > 0 (overflow there is benign), so no clamp needed.
    return jnp.where(x > 0, x, jnp.exp(x) - 1.0)


def _bn_normalize(x):
    # nn.BatchNorm1d, training mode, biased variance.  gamma/beta are folded
    # into the next Linear at init, so only the normalization remains.
    # Single fused cross-sublane reduction over the lane-concatenated [x | x*x].
    inv_b = 1.0 / float(BATCH)
    xx = jnp.concatenate([x, x * x], axis=1)              # (B, 2H)
    s = jnp.sum(xx, axis=0, keepdims=True) * inv_b        # (1, 2H)
    mu = s[:, :HIDDEN]
    var = s[:, HIDDEN:] - mu * mu
    scale = jax.lax.rsqrt(var + BN_EPS)
    return x * scale - mu * scale


def _dsum(x):
    # Reduce a d-major (B, K*D) slab over the dim axis -> (B, K).
    acc = x[:, 0:K]
    for d in range(1, D):
        acc = acc + x[:, d * K:(d + 1) * K]
    return acc


# --------------------------------- kernel -----------------------------------
def mdn_loss_kernel(data_ref, ctx_ref, w_ref, vec_ref, loss_ref):
    inv_b = 1.0 / float(BATCH)

    data = data_ref[...]                                   # (B, D)
    b0 = vec_ref[:, B0_OFF:B0_OFF + HIDDEN]                # (1, H)
    b1 = vec_ref[:, B1_OFF:B1_OFF + HIDDEN]                # (1, H)

    w0 = w_ref[W0_ROW:W0_ROW + CONTEXT_DIM, 0:HIDDEN]      # (C, H)
    w1 = w_ref[W1_ROW:W1_ROW + HIDDEN, 0:HIDDEN]           # (H, H)
    waug = w_ref[WAUG_ROW:WAUG_ROW + HIDDEN + D + 1, :]    # (H+D+1, OUT_PAD)

    # ---- MLP: (Linear + ELU + BN) x 2 ----
    h = jnp.dot(ctx_ref[...], w0, preferred_element_type=jnp.float32) + b0
    h = _bn_normalize(_elu(h))
    h = jnp.dot(h, w1, preferred_element_type=jnp.float32) + b1
    h = _bn_normalize(_elu(h))

    # ---- augmented output layer: [h | data | 1] @ W_aug ----
    ones = jnp.ones((BATCH, 1), jnp.float32)
    hcat = jnp.concatenate([h, data, ones], axis=1)        # (B, H + D + 1)
    out = jnp.dot(hcat, waug, preferred_element_type=jnp.float32)  # (B, OUT_PAD)

    # Every slab below starts at lane offset 0 of its own 128-lane slab.
    logits = out[:, LOGITS_OFF:LOGITS_OFF + K]             # (B, K)
    nd = out[:, MEAN_OFF:MEAN_OFF + KD]                    # (B, KD) = mean - data
    raw = out[:, DIAG_OFF:DIAG_OFF + KD]                   # (B, KD) raw diag
    W = [out[:, _w_off(r):_w_off(r) + KD] for r in range(R)]

    # ---- Woodbury / capacitance log-prob (== LowRankMultivariateNormal) ----
    diag = jnp.exp(raw) + 1e-5                             # one EUP exp, (B, KD)
    dinv = 1.0 / diag
    dd = nd * dinv                                         # D^{-1} (mu - x)

    maha1 = _dsum(dd * nd)                                 # (x-mu)^T D^{-1} (x-mu)
    wt = [_dsum(W[r] * dd) for r in range(R)]              # = -(W^T D^{-1} (x-mu))
    Wd = [W[r] * dinv for r in range(R)]

    # capacitance C = I_R + W^T D^{-1} W   (lower triangle)
    C = [[None] * R for _ in range(R)]
    for i in range(R):
        for j in range(i + 1):
            acc = _dsum(Wd[i] * W[j])
            C[i][j] = acc + 1.0 if i == j else acc

    # Cholesky of C (rank tiny & static): rsqrt + multiplies, no divides
    L = [[None] * R for _ in range(R)]
    Ldiag_sq = [None] * R
    inv_Ld = [None] * R
    for i in range(R):
        for j in range(i + 1):
            s = C[i][j]
            for m in range(j):
                s = s - L[i][m] * L[j][m]
            if i == j:
                Ldiag_sq[i] = s
                inv_Ld[i] = jax.lax.rsqrt(s)
                L[i][i] = s * inv_Ld[i]
            else:
                L[i][j] = s * inv_Ld[j]

    # forward substitution: L y = W^T D^{-1} (x - mu)   (sign cancels in y^T y)
    y = [None] * R
    for i in range(R):
        s = wt[i]
        for m in range(i):
            s = s - L[i][m] * y[m]
        y[i] = s * inv_Ld[i]

    maha2 = y[0] * y[0]
    for r in range(1, R):
        maha2 = maha2 + y[r] * y[r]
    maha = maha1 - maha2                                   # (B, K)

    # logdet = sum_d log(diag_d) + sum_r log(L_rr^2), accumulated in log space
    logdet = _dsum(jnp.log(diag))
    cap = Ldiag_sq[0]
    for r in range(1, R):
        cap = cap * Ldiag_sq[r]
    logdet = logdet + jnp.log(cap)

    comp_lp = -0.5 * (D * LOG2PI + logdet + maha)          # (B, K)

    # ---- Categorical log-normalizer + MixtureSameFamily logsumexp ----
    wmax = jnp.max(logits, axis=-1, keepdims=True)
    wlse = jnp.log(jnp.sum(jnp.exp(logits - wmax), axis=-1, keepdims=True)) + wmax
    t = logits + comp_lp
    tmax = jnp.max(t, axis=-1, keepdims=True)
    tlse = jnp.log(jnp.sum(jnp.exp(t - tmax), axis=-1, keepdims=True)) + tmax
    log_prob = tlse - wlse                                 # (B, 1)

    # loss = -mean(log_prob)
    loss_ref[...] = -jnp.sum(log_prob, axis=0, keepdims=True) * inv_b


# ------------------------------- wrapper -------------------------------------
@jax.jit
def mdn_loss(data, context, wpack, vec):
    inputs = (data, context, wpack, vec)
    in_specs = [pl.BlockSpec(memory_space=pltpu.MemorySpace.VMEM) for _ in inputs]
    out = pl.pallas_call(
        mdn_loss_kernel,
        out_shape=jax.ShapeDtypeStruct((1, 1), jnp.float32),
        in_specs=in_specs,
        out_specs=pl.BlockSpec(memory_space=pltpu.MemorySpace.VMEM),
    )(*inputs)
    return out[0, 0]


# --------------------------- pure-JAX reference ------------------------------
def reference_loss(data, context, params):
    w0, b0, g0, be0, w1, b1, g1, be1, wo, bo = params

    def bn(x, g, b):
        mu = x.mean(0, keepdims=True)
        var = ((x - mu) ** 2).mean(0, keepdims=True)
        return (x - mu) / jnp.sqrt(var + BN_EPS) * g + b

    def elu(x):
        return jnp.where(x > 0, x, jnp.exp(jnp.minimum(x, 0.0)) - 1.0)

    h = bn(elu(context @ w0 + b0), g0, be0)
    h = bn(elu(h @ w1 + b1), g1, be1)
    out = h @ wo + bo

    B = data.shape[0]
    logits = out[:, :K]
    means = out[:, K:K + K * D].reshape(B, K, D)
    cov = out[:, K + K * D:].reshape(B, K, D + D * R)
    cov_diag = jnp.exp(cov[:, :, :D]) + 1e-5
    cov_factor = cov[:, :, D:].reshape(B, K, D, R)

    sigma = cov_factor @ jnp.swapaxes(cov_factor, -1, -2) + jnp.eye(D) * cov_diag[..., None]
    diff = data[:, None, :] - means
    sol = jnp.linalg.solve(sigma, diff[..., None])[..., 0]
    maha = jnp.sum(diff * sol, axis=-1)
    _, logdet = jnp.linalg.slogdet(sigma)
    comp_lp = -0.5 * (D * LOG2PI + logdet + maha)
    logw = jax.nn.log_softmax(logits, axis=1)
    lp = jax.scipy.special.logsumexp(logw + comp_lp, axis=1)
    return -jnp.mean(lp)


# ------------------------------- main ----------------------------------------
def _init_params(key):
    def linear(kw, kb, fin, fout):
        bound = 1.0 / math.sqrt(fin)
        W = jax.random.uniform(kw, (fin, fout), jnp.float32, -bound, bound)
        b = jax.random.uniform(kb, (1, fout), jnp.float32, -bound, bound)
        return W, b

    ks = jax.random.split(key, 6)
    w0, b0 = linear(ks[0], ks[1], CONTEXT_DIM, HIDDEN)
    w1, b1 = linear(ks[2], ks[3], HIDDEN, HIDDEN)
    wo, bo = linear(ks[4], ks[5], HIDDEN, TOTAL)
    # BatchNorm1d defaults: gamma=1, beta=0
    g0 = jnp.ones((1, HIDDEN), jnp.float32)
    be0 = jnp.zeros((1, HIDDEN), jnp.float32)
    g1 = jnp.ones((1, HIDDEN), jnp.float32)
    be1 = jnp.zeros((1, HIDDEN), jnp.float32)
    return (w0, b0, g0, be0, w1, b1, g1, be1, wo, bo)


if __name__ == "__main__":
    key = jax.random.PRNGKey(0)
    k_data, k_ctx, k_par = jax.random.split(key, 3)
    data = jax.random.normal(k_data, (BATCH, DIM), jnp.float32)
    context = jax.random.normal(k_ctx, (BATCH, CONTEXT_DIM), jnp.float32)
    params = _init_params(k_par)

    # One-time repacking (permutation, padding, BN-affine fold) — off the
    # per-call path, so the jitted step only runs the pallas_call.
    wpack, vec = prepare_kernel_params(params)
    wpack, vec = jax.device_put(wpack), jax.device_put(vec)

    loss = mdn_loss(data, context, wpack, vec)
    jax.block_until_ready(loss)

    ref = reference_loss(data, context, params)
    assert jnp.isfinite(loss), loss
    assert jnp.allclose(loss, ref, rtol=5e-3, atol=5e-3), (float(loss), float(ref))

    print("KERNEL_OK")
</pallas_src>

<mosaic_0001>
module attributes {stable_mosaic.version = 11 : i64} {
  func.func @mdn_loss_kernel(%arg0: memref<8x3xf32, #tpu.memory_space<vmem>>, %arg1: memref<8x5xf32, #tpu.memory_space<vmem>>, %arg2: memref<80x640xf32, #tpu.memory_space<vmem>>, %arg3: memref<1x256xf32, #tpu.memory_space<vmem>>, %arg4: memref<1x1xf32, #tpu.memory_space<vmem>>) attributes {dimension_semantics = [], scalar_prefetch = 0 : i64, scratch_operands = 0 : i64, tpu.core_type = #tpu.core_type<tc>} {
    %c0 = arith.constant 0 : index
    %c0_0 = arith.constant 0 : index
    %0 = vector.load %arg0[%c0, %c0_0] : memref<8x3xf32, #tpu.memory_space<vmem>>, vector<8x3xf32>
    %c0_1 = arith.constant 0 : index
    %c0_2 = arith.constant 0 : index
    %1 = vector.load %arg3[%c0_1, %c0_2] : memref<1x256xf32, #tpu.memory_space<vmem>>, vector<1x32xf32>
    %c0_3 = arith.constant 0 : index
    %c128 = arith.constant 128 : index
    %2 = vector.load %arg3[%c0_3, %c128] : memref<1x256xf32, #tpu.memory_space<vmem>>, vector<1x32xf32>
    %c0_4 = arith.constant 0 : index
    %c0_5 = arith.constant 0 : index
    %3 = vector.load %arg2[%c0_4, %c0_5] : memref<80x640xf32, #tpu.memory_space<vmem>>, vector<5x32xf32>
    %c8 = arith.constant 8 : index
    %c0_6 = arith.constant 0 : index
    %4 = vector.load %arg2[%c8, %c0_6] : memref<80x640xf32, #tpu.memory_space<vmem>>, vector<32x32xf32>
    %c40 = arith.constant 40 : index
    %c0_7 = arith.constant 0 : index
    %5 = vector.load %arg2[%c40, %c0_7] : memref<80x640xf32, #tpu.memory_space<vmem>>, vector<36x640xf32>
    %c0_8 = arith.constant 0 : index
    %c0_9 = arith.constant 0 : index
    %6 = vector.load %arg1[%c0_8, %c0_9] : memref<8x5xf32, #tpu.memory_space<vmem>>, vector<8x5xf32>
    %cst = arith.constant dense<0.000000e+00> : vector<8x32xf32>
    %7 = tpu.matmul %6, %3, %cst {dimension_numbers = #tpu.dot_dimension_numbers<[1], [0], [0], [1], [0, 0, 1, 1], [], []>} : vector<8x5xf32>, vector<5x32xf32>, vector<8x32xf32> -> vector<8x32xf32>
    %8 = vector.broadcast %1 : vector<1x32xf32> to vector<8x32xf32>
    %9 = arith.addf %7, %8 : vector<8x32xf32>
    %cst_10 = arith.constant 0.000000e+00 : f32
    %10 = vector.broadcast %cst_10 : f32 to vector<8x32xf32>
    %11 = arith.cmpf ogt, %9, %10 : vector<8x32xf32>
    %12 = math.exp %9 : vector<8x32xf32>
    %cst_11 = arith.constant 1.000000e+00 : f32
    %13 = vector.broadcast %cst_11 : f32 to vector<8x32xf32>
    %14 = arith.subf %12, %13 : vector<8x32xf32>
    %15 = arith.select %11, %9, %14 : vector<8x32xi1>, vector<8x32xf32>
    %16 = arith.mulf %15, %15 : vector<8x32xf32>
    %17 = tpu.concatenate %15, %16 in 1 : vector<8x32xf32>, vector<8x32xf32> -> vector<8x64xf32>
    %cst_12 = arith.constant dense<0.000000e+00> : vector<64xf32>
    %18 = vector.multi_reduction <add>, %17, %cst_12 [0] : vector<8x64xf32> to vector<64xf32>
    %19 = vector.shape_cast %18 : vector<64xf32> to vector<1x64xf32>
    %cst_13 = arith.constant 1.250000e-01 : f32
    %20 = vector.broadcast %cst_13 : f32 to vector<1x64xf32>
    %21 = arith.mulf %19, %20 : vector<1x64xf32>
    %22 = vector.extract_strided_slice %21 {offsets = [0, 0], sizes = [1, 32], strides = [1, 1]} : vector<1x64xf32> to vector<1x32xf32>
    %23 = vector.extract_strided_slice %21 {offsets = [0, 32], sizes = [1, 32], strides = [1, 1]} : vector<1x64xf32> to vector<1x32xf32>
    %24 = arith.mulf %22, %22 : vector<1x32xf32>
    %25 = arith.subf %23, %24 : vector<1x32xf32>
    %cst_14 = arith.constant 9.99999974E-6 : f32
    %26 = vector.broadcast %cst_14 : f32 to vector<1x32xf32>
    %27 = arith.addf %25, %26 : vector<1x32xf32>
    %28 = math.rsqrt %27 : vector<1x32xf32>
    %29 = vector.broadcast %28 : vector<1x32xf32> to vector<8x32xf32>
    %30 = arith.mulf %15, %29 : vector<8x32xf32>
    %31 = arith.mulf %22, %28 : vector<1x32xf32>
    %32 = vector.broadcast %31 : vector<1x32xf32> to vector<8x32xf32>
    %33 = arith.subf %30, %32 : vector<8x32xf32>
    %cst_15 = arith.constant dense<0.000000e+00> : vector<8x32xf32>
    %34 = tpu.matmul %33, %4, %cst_15 {dimension_numbers = #tpu.dot_dimension_numbers<[1], [0], [0], [1], [0, 0, 1, 1], [], []>} : vector<8x32xf32>, vector<32x32xf32>, vector<8x32xf32> -> vector<8x32xf32>
    %35 = vector.broadcast %2 : vector<1x32xf32> to vector<8x32xf32>
    %36 = arith.addf %34, %35 : vector<8x32xf32>
    %cst_16 = arith.constant 0.000000e+00 : f32
    %37 = vector.broadcast %cst_16 : f32 to vector<8x32xf32>
    %38 = arith.cmpf ogt, %36, %37 : vector<8x32xf32>
    %39 = math.exp %36 : vector<8x32xf32>
    %cst_17 = arith.constant 1.000000e+00 : f32
    %40 = vector.broadcast %cst_17 : f32 to vector<8x32xf32>
    %41 = arith.subf %39, %40 : vector<8x32xf32>
    %42 = arith.select %38, %36, %41 : vector<8x32xi1>, vector<8x32xf32>
    %43 = arith.mulf %42, %42 : vector<8x32xf32>
    %44 = tpu.concatenate %42, %43 in 1 : vector<8x32xf32>, vector<8x32xf32> -> vector<8x64xf32>
    %cst_18 = arith.constant dense<0.000000e+00> : vector<64xf32>
    %45 = vector.multi_reduction <add>, %44, %cst_18 [0] : vector<8x64xf32> to vector<64xf32>
    %46 = vector.shape_cast %45 : vector<64xf32> to vector<1x64xf32>
    %cst_19 = arith.constant 1.250000e-01 : f32
    %47 = vector.broadcast %cst_19 : f32 to vector<1x64xf32>
    %48 = arith.mulf %46, %47 : vector<1x64xf32>
    %49 = vector.extract_strided_slice %48 {offsets = [0, 0], sizes = [1, 32], strides = [1, 1]} : vector<1x64xf32> to vector<1x32xf32>
    %50 = vector.extract_strided_slice %48 {offsets = [0, 32], sizes = [1, 32], strides = [1, 1]} : vector<1x64xf32> to vector<1x32xf32>
    %51 = arith.mulf %49, %49 : vector<1x32xf32>
    %52 = arith.subf %50, %51 : vector<1x32xf32>
    %cst_20 = arith.constant 9.99999974E-6 : f32
    %53 = vector.broadcast %cst_20 : f32 to vector<1x32xf32>
    %54 = arith.addf %52, %53 : vector<1x32xf32>
    %55 = math.rsqrt %54 : vector<1x32xf32>
    %56 = vector.broadcast %55 : vector<1x32xf32> to vector<8x32xf32>
    %57 = arith.mulf %42, %56 : vector<8x32xf32>
    %58 = arith.mulf %49, %55 : vector<1x32xf32>
    %59 = vector.broadcast %58 : vector<1x32xf32> to vector<8x32xf32>
    %60 = arith.subf %57, %59 : vector<8x32xf32>
    %cst_21 = arith.constant 1.000000e+00 : f32
    %61 = vector.broadcast %cst_21 : f32 to vector<8x1xf32>
    %62 = tpu.concatenate %60, %0, %61 in 1 : vector<8x32xf32>, vector<8x3xf32>, vector<8x1xf32> -> vector<8x36xf32>
    %cst_22 = arith.constant dense<0.000000e+00> : vector<8x640xf32>
    %63 = tpu.matmul %62, %5, %cst_22 {dimension_numbers = #tpu.dot_dimension_numbers<[1], [0], [0], [1], [0, 0, 1, 1], [], []>} : vector<8x36xf32>, vector<36x640xf32>, vector<8x640xf32> -> vector<8x640xf32>
    %64 = vector.extract_strided_slice %63 {offsets = [0, 0], sizes = [8, 4], strides = [1, 1]} : vector<8x640xf32> to vector<8x4xf32>
    %65 = vector.extract_strided_slice %63 {offsets = [0, 128], sizes = [8, 12], strides = [1, 1]} : vector<8x640xf32> to vector<8x12xf32>
    %66 = vector.extract_strided_slice %63 {offsets = [0, 256], sizes = [8, 12], strides = [1, 1]} : vector<8x640xf32> to vector<8x12xf32>
    %67 = vector.extract_strided_slice %63 {offsets = [0, 384], sizes = [8, 12], strides = [1, 1]} : vector<8x640xf32> to vector<8x12xf32>
    %68 = vector.extract_strided_slice %63 {offsets = [0, 512], sizes = [8, 12], strides = [1, 1]} : vector<8x640xf32> to vector<8x12xf32>
    %69 = math.exp %66 : vector<8x12xf32>
    %cst_23 = arith.constant 9.99999974E-6 : f32
    %70 = vector.broadcast %cst_23 : f32 to vector<8x12xf32>
    %71 = arith.addf %69, %70 : vector<8x12xf32>
    %cst_24 = arith.constant 1.000000e+00 : f32
    %72 = vector.broadcast %cst_24 : f32 to vector<8x12xf32>
    %73 = arith.divf %72, %71 : vector<8x12xf32>
    %74 = arith.mulf %65, %73 : vector<8x12xf32>
    %75 = arith.mulf %74, %65 : vector<8x12xf32>
    %76 = vector.extract_strided_slice %75 {offsets = [0, 0], sizes = [8, 4], strides = [1, 1]} : vector<8x12xf32> to vector<8x4xf32>
    %77 = vector.extract_strided_slice %75 {offsets = [0, 4], sizes = [8, 4], strides = [1, 1]} : vector<8x12xf32> to vector<8x4xf32>
    %78 = arith.addf %76, %77 : vector<8x4xf32>
    %79 = vector.extract_strided_slice %75 {offsets = [0, 8], sizes = [8, 4], strides = [1, 1]} : vector<8x12xf32> to vector<8x4xf32>
    %80 = arith.addf %78, %79 : vector<8x4xf32>
    %81 = arith.mulf %67, %74 : vector<8x12xf32>
    %82 = vector.extract_strided_slice %81 {offsets = [0, 0], sizes = [8, 4], strides = [1, 1]} : vector<8x12xf32> to vector<8x4xf32>
    %83 = vector.extract_strided_slice %81 {offsets = [0, 4], sizes = [8, 4], strides = [1, 1]} : vector<8x12xf32> to vector<8x4xf32>
    %84 = arith.addf %82, %83 : vector<8x4xf32>
    %85 = vector.extract_strided_slice %81 {offsets = [0, 8], sizes = [8, 4], strides = [1, 1]} : vector<8x12xf32> to vector<8x4xf32>
    %86 = arith.addf %84, %85 : vector<8x4xf32>
    %87 = arith.mulf %68, %74 : vector<8x12xf32>
    %88 = vector.extract_strided_slice %87 {offsets = [0, 0], sizes = [8, 4], strides = [1, 1]} : vector<8x12xf32> to vector<8x4xf32>
    %89 = vector.extract_strided_slice %87 {offsets = [0, 4], sizes = [8, 4], strides = [1, 1]} : vector<8x12xf32> to vector<8x4xf32>
    %90 = arith.addf %88, %89 : vector<8x4xf32>
    %91 = vector.extract_strided_slice %87 {offsets = [0, 8], sizes = [8, 4], strides = [1, 1]} : vector<8x12xf32> to vector<8x4xf32>
    %92 = arith.addf %90, %91 : vector<8x4xf32>
    %93 = arith.mulf %67, %73 : vector<8x12xf32>
    %94 = arith.mulf %68, %73 : vector<8x12xf32>
    %95 = arith.mulf %93, %67 : vector<8x12xf32>
    %96 = vector.extract_strided_slice %95 {offsets = [0, 0], sizes = [8, 4], strides = [1, 1]} : vector<8x12xf32> to vector<8x4xf32>
    %97 = vector.extract_strided_slice %95 {offsets = [0, 4], sizes = [8, 4], strides = [1, 1]} : vector<8x12xf32> to vector<8x4xf32>
    %98 = arith.addf %96, %97 : vector<8x4xf32>
    %99 = vector.extract_strided_slice %95 {offsets = [0, 8], sizes = [8, 4], strides = [1, 1]} : vector<8x12xf32> to vector<8x4xf32>
    %100 = arith.addf %98, %99 : vector<8x4xf32>
    %cst_25 = arith.constant 1.000000e+00 : f32
    %101 = vector.broadcast %cst_25 : f32 to vector<8x4xf32>
    %102 = arith.addf %100, %101 : vector<8x4xf32>
    %103 = arith.mulf %94, %67 : vector<8x12xf32>
    %104 = vector.extract_strided_slice %103 {offsets = [0, 0], sizes = [8, 4], strides = [1, 1]} : vector<8x12xf32> to vector<8x4xf32>
    %105 = vector.extract_strided_slice %103 {offsets = [0, 4], sizes = [8, 4], strides = [1, 1]} : vector<8x12xf32> to vector<8x4xf32>
    %106 = arith.addf %104, %105 : vector<8x4xf32>
    %107 = vector.extract_strided_slice %103 {offsets = [0, 8], sizes = [8, 4], strides = [1, 1]} : vector<8x12xf32> to vector<8x4xf32>
    %108 = arith.addf %106, %107 : vector<8x4xf32>
    %109 = arith.mulf %94, %68 : vector<8x12xf32>
    %110 = vector.extract_strided_slice %109 {offsets = [0, 0], sizes = [8, 4], strides = [1, 1]} : vector<8x12xf32> to vector<8x4xf32>
    %111 = vector.extract_strided_slice %109 {offsets = [0, 4], sizes = [8, 4], strides = [1, 1]} : vector<8x12xf32> to vector<8x4xf32>
    %112 = arith.addf %110, %111 : vector<8x4xf32>
    %113 = vector.extract_strided_slice %109 {offsets = [0, 8], sizes = [8, 4], strides = [1, 1]} : vector<8x12xf32> to vector<8x4xf32>
    %114 = arith.addf %112, %113 : vector<8x4xf32>
    %cst_26 = arith.constant 1.000000e+00 : f32
    %115 = vector.broadcast %cst_26 : f32 to vector<8x4xf32>
    %116 = arith.addf %114, %115 : vector<8x4xf32>
    %117 = math.rsqrt %102 : vector<8x4xf32>
    %118 = arith.mulf %108, %117 : vector<8x4xf32>
    %119 = arith.mulf %118, %118 : vector<8x4xf32>
    %120 = arith.subf %116, %119 : vector<8x4xf32>
    %121 = math.rsqrt %120 : vector<8x4xf32>
    %122 = arith.mulf %86, %117 : vector<8x4xf32>
    %123 = arith.mulf %118, %122 : vector<8x4xf32>
    %124 = arith.subf %92, %123 : vector<8x4xf32>
    %125 = arith.mulf %124, %121 : vector<8x4xf32>
    %126 = arith.mulf %122, %122 : vector<8x4xf32>
    %127 = arith.mulf %125, %125 : vector<8x4xf32>
    %128 = arith.addf %126, %127 : vector<8x4xf32>
    %129 = arith.subf %80, %128 : vector<8x4xf32>
    %130 = math.log %71 : vector<8x12xf32>
    %131 = vector.extract_strided_slice %130 {offsets = [0, 0], sizes = [8, 4], strides = [1, 1]} : vector<8x12xf32> to vector<8x4xf32>
    %132 = vector.extract_strided_slice %130 {offsets = [0, 4], sizes = [8, 4], strides = [1, 1]} : vector<8x12xf32> to vector<8x4xf32>
    %133 = arith.addf %131, %132 : vector<8x4xf32>
    %134 = vector.extract_strided_slice %130 {offsets = [0, 8], sizes = [8, 4], strides = [1, 1]} : vector<8x12xf32> to vector<8x4xf32>
    %135 = arith.addf %133, %134 : vector<8x4xf32>
    %136 = arith.mulf %102, %120 : vector<8x4xf32>
    %137 = math.log %136 : vector<8x4xf32>
    %138 = arith.addf %135, %137 : vector<8x4xf32>
    %cst_27 = arith.constant 5.51363134 : f32
    %139 = vector.broadcast %cst_27 : f32 to vector<8x4xf32>
    %140 = arith.addf %139, %138 : vector<8x4xf32>
    %141 = arith.addf %140, %129 : vector<8x4xf32>
    %cst_28 = arith.constant -5.000000e-01 : f32
    %142 = vector.broadcast %cst_28 : f32 to vector<8x4xf32>
    %143 = arith.mulf %142, %141 : vector<8x4xf32>
    %cst_29 = arith.constant dense<0xFF800000> : vector<8xf32>
    %144 = vector.multi_reduction <maximumf>, %64, %cst_29 [1] : vector<8x4xf32> to vector<8xf32>
    %145 = vector.shape_cast %144 : vector<8xf32> to vector<8x1xf32>
    %146 = vector.broadcast %145 : vector<8x1xf32> to vector<8x4xf32>
    %147 = arith.subf %64, %146 : vector<8x4xf32>
    %148 = math.exp %147 : vector<8x4xf32>
    %cst_30 = arith.constant dense<0.000000e+00> : vector<8xf32>
    %149 = vector.multi_reduction <add>, %148, %cst_30 [1] : vector<8x4xf32> to vector<8xf32>
    %150 = vector.shape_cast %149 : vector<8xf32> to vector<8x1xf32>
    %151 = math.log %150 : vector<8x1xf32>
    %152 = arith.addf %151, %145 : vector<8x1xf32>
    %153 = arith.addf %64, %143 : vector<8x4xf32>
    %cst_31 = arith.constant dense<0xFF800000> : vector<8xf32>
    %154 = vector.multi_reduction <maximumf>, %153, %cst_31 [1] : vector<8x4xf32> to vector<8xf32>
    %155 = vector.shape_cast %154 : vector<8xf32> to vector<8x1xf32>
    %156 = vector.broadcast %155 : vector<8x1xf32> to vector<8x4xf32>
    %157 = arith.subf %153, %156 : vector<8x4xf32>
    %158 = math.exp %157 : vector<8x4xf32>
    %cst_32 = arith.constant dense<0.000000e+00> : vector<8xf32>
    %159 = vector.multi_reduction <add>, %158, %cst_32 [1] : vector<8x4xf32> to vector<8xf32>
    %160 = vector.shape_cast %159 : vector<8xf32> to vector<8x1xf32>
    %161 = math.log %160 : vector<8x1xf32>
    %162 = arith.addf %161, %155 : vector<8x1xf32>
    %163 = arith.subf %162, %152 : vector<8x1xf32>
    %cst_33 = arith.constant dense<0.000000e+00> : vector<1xf32>
    %164 = vector.multi_reduction <add>, %163, %cst_33 [0] : vector<8x1xf32> to vector<1xf32>
    %165 = vector.shape_cast %164 : vector<1xf32> to vector<1x1xf32>
    %cst_34 = arith.constant 0.000000e+00 : f32
    %166 = vector.broadcast %cst_34 : f32 to vector<1x1xf32>
    %167 = arith.subf %166, %165 : vector<1x1xf32>
    %cst_35 = arith.constant 1.250000e-01 : f32
    %168 = vector.broadcast %cst_35 : f32 to vector<1x1xf32>
    %169 = arith.mulf %167, %168 : vector<1x1xf32>
    %c0_36 = arith.constant 0 : index
    %c0_37 = arith.constant 0 : index
    %170 = vector.load %arg4[%c0_36, %c0_37] : memref<1x1xf32, #tpu.memory_space<vmem>>, vector<1x1xf32>
    tpu.vector_store %arg4[%c0_36, %c0_37], %169 {strides = array<i32>} : memref<1x1xf32, #tpu.memory_space<vmem>>, vector<1x1xf32>,
    return
  }
}

</mosaic_0001>

<bundles_post_ra>
// kernel: mdn_loss.1
= control target key start
LH: loop header
LB: loop body
LE: loop exit
PB: predicated region body
PF: predicated region fallthrough
CT: control target
= control target key end

     0   :  { %9 = vsyncpa [#allocation3], 0  ;;  %s969_s0 = inlined_call_operand.vmem [shape: f32[8,3], index: 0, kind: input, shape index: {}]   ;;  %s970_s1 = inlined_call_operand.vmem [shape: f32[8,5], index: 1, kind: input, shape index: {}]   ;;  %s971_s2 = inlined_call_operand.hbm [shape: f32[80,640], index: 2, kind: input, shape index: {}]   ;;  %s972_s3 = inlined_call_operand.vmem [shape: f32[1,256], index: 3, kind: input, shape index: {}]   ;;  %s973_s4 = inlined_call_operand.hbm [shape: f32[1,1], index: 4, kind: output, shape index: {}]  }
   0x1   :  { %10 = vsyncpa [#allocation4], 0  ;;  %s854_s15 = smov [#allocation2]  }
   0x2   :  { %s20_s16 = sshll.u32 %s854_s15, 4  ;;  %s21_s16 = int_to_ptr.vmem [resolvable:$true] %s20_s16 }
   0x3   :  { %s818_s17 = scalar_lea.vmem %s21_s16, 6400  ;;  %p823_p1 = scmp.lt.s32.totalorder %s21_s16, %s21_s16 }
   0x4   :  { %p819_p0 = scmp.ne.s32.totalorder %s21_s16, %s818_s17  ;;  %p824_p2 = scmp.lt.s32.totalorder %s818_s17, %s818_s17 }
   0x6   :  { %p825_p3 = por %p824_p2, %p823_p1 }
   0x8   :  { %p826_p4 = pnand %p825_p3, %p819_p0 }
   0xa   :  { %829 = shalt.err (!%p826_p4)
}
   0xb   :  { %s855_s18 = smov 640   ;;  %s856_s19 = smov 40  }
   0xc   :  { %26 = dma.hbm_to_vmem [thread:$0]  %s971_s2, 6400, %s21_s16, [#allocation3], %s855_s18, %s855_s18, %s856_s19  }
   0xd   :  { %850 = dma.done.wait [#allocation3], 6400  }
   0xe   :  { %851 = vsyncadd [#allocation3], 4294960896  ;;  %v857_v0 = vmov 0.0   ;;  %vm858_vm0 = vmmov 0   ;;  %vm76_vm1 = vcmask 1044480   ;;  %vm72_vm2 = vcmask 39936  }
   0xf   :  { %743 = vmatprep.subr.mxu1 %v857_v0  ;;  %745 = vmatprep.mubr.msk.f32.mxu1 %vm858_vm0, %v857_v0  ;;  %v35_v1 = vld [vmem:[#allocation2] sm:$0x1f]  ;;  %vm160_vm4 = vcmask 261120   ;;  %vm162_vm5 = vcmask 523264   ;;  %v38_v27 = vld [vmem:[#allocation2 + $0x78] sm:$0xff]  ;;  %v179_v28 = vlaneseq  ;;  %v37_v29 = vld [vmem:[#allocation2 + $0x50] sm:$0xff] }
  0x10   :  { %414 = vmatprep.mubr.f32.mxu0 %v857_v0  ;;  %v65_v2 = vld [vmem:[%s970_s1] sm:$0xff]  ;;  %744 = vmatpush3.msk.msra.mxu1 %vm76_vm1, %v35_v1  ;;  %s859_s1 = smov 32   ;;  %v36_v30 = vld [vmem:[#allocation2 + $0x28] sm:$0xff]  ;;  %s860_s25 = smov 96   ;;  %v61_v61 = vld [vmem:[#allocation2 + $0x170] sm:$0xf] }
  0x11   :  { %746 = vmatmul.mubr.msk.f32.vlgmr.msra.gmra.mxu1 %vm72_vm2, %v65_v2  ;;  %748 = vmatprep.subr.mxu1 %v857_v0  ;;  %v715_v3 = vld [vmem:[%s972_s3] ss:$0 sm:$0xff]  ;;  %v180_v31 = vshrl.u32 %v179_v28, 7  ;;  %v719_v41 = vld [vmem:[%s972_s3 + $0x1] ss:$0 sm:$0xff]  ;;  %vm334_vm7 = vcmask 1043456  }
  0x12   :  { %756 = vmatprep.mubr.msk.f32.mxu1 %vm858_vm0, %v857_v0  ;;  %v39_v26 = vld [vmem:[#allocation2 + $0xa0] sm:$0xff]  ;;  %v60_v62 = vld [vmem:[#allocation2 + $0x168] sm:$0xf]  ;;  %722 = vmatprep.subr.msk.mxu0 %vm334_vm7, %v61_v61  ;;  %v62_v2 = vld [vmem:[#allocation2 + $0x178] sm:$0xf]  ;;  %vm328_vm8 = vcmask 285696  }
  0x13   :  { %749 = vmatpush3.msra.mxu1 %v39_v26  ;;  %v912_v32 = vsub.s32 0, %v180_v31  ;;  %v56_v63 = vld [vmem:[#allocation2 + $0x148] sm:$0xff]  ;;  %v63_v1 = vld [vmem:[#allocation2 + $0x180] sm:$0xf]  ;;  %723 = vmatpush1.msk.msra.mxu0 %vm334_vm7, %v60_v62  ;;  %vm330_vm9 = vcmask 293888   ;;  %s862_s29 = smov 124  }
  0x14   :  { %750 = vmatprep.subr.mxu1 %v857_v0  ;;  %374 = vmatprep.subr.mxu0 %v56_v63  ;;  %vm663_vm10 = vcmask 31744   ;;  %s863_s30 = smov [#allocation5]   ;;  %vm698_vm11 = vcmask 0  }
  0x15   :  { %751 = vmatpush3.msra.mxu1 %v38_v27  ;;  %s706_s5 = sshll.u32 %s863_s30, 4  ;;  %s707_s5 = int_to_ptr.vmem [resolvable:$true] %s706_s5 }
  0x16   :  { %752 = vmatprep.subr.mxu1 %v857_v0  ;;  %s830_s6 = scalar_lea.vmem %s707_s5, 16  ;;  %s834_s7 = scalar_lea.vmem %s707_s5, 32 }
  0x17   :  { %753 = vmatpush3.msra.mxu1 %v37_v29  ;;  %p831_p5 = scmp.ne.s32.totalorder %s707_s5, %s830_s6  ;;  %p835_p6 = scmp.lt.s32.totalorder %s707_s5, %s707_s5 }
  0x18   :  { %754 = vmatprep.subr.mxu1 %v857_v0  ;;  %p836_p7 = scmp.lt.s32.totalorder %s834_s7, %s830_s6 }
  0x19   :  { %755 = vmatpush3.msra.mxu1 %v36_v30 }
  0x1a   :  { %725 = vmatprep.subr.msk.mxu1 %vm334_vm7, %v63_v1  ;;  %p837_p8 = por %p836_p7, %p835_p6 }
  0x1c   :  { %p838_p9 = pnand %p837_p8, %p831_p5 }
  0xd1   :  { %v146_v4 = vpop.f32.mrf.mxu1 }
  0xd2   :  { %v147_v5 = vadd.f32 %v715_v3, %v146_v4 }
  0xd3   :  { %v747_v6 = vpop.f32.mrf.mxu1 }
  0xd4   :  { %v151_v7 = vmul.f32 1.442695, %v147_v5  ;;  %vm150_vm3 = vcmp.gt.f32.partialorder %v147_v5, 0.0  ;;  %v55_v6 = vld [vmem:[#allocation2 + $0x140] sm:$0xff] }
  0xd5   :  { %375 = vmatpush1.msra.mxu0 %v55_v6 }
  0xd6   :  { %782 = vpow2.f32 %v151_v7  ;;  %v58_v7 = vld [vmem:[#allocation2 + $0x158] sm:$0xff] }
  0xe3   :  { %v783_v8 = vpop.eup %782 }
  0xe4   :  { %v718_v9 = vadd.f32 -1.0, %v783_v8  ;;  %v51_v8 = vld [vmem:[#allocation2 + $0x120] sm:$0xff] }
  0xe5   :  { %376 = vmatprep.subr.mxu0 %v51_v8 }
  0xe6   :  { %v154_v10 = vsel %vm150_vm3, %v147_v5, %v718_v9  ;;  %v57_v9 = vld [vmem:[#allocation2 + $0x150] sm:$0xff] }
  0xe7   :  { %v155_v11 = vmul.f32 %v154_v10, %v154_v10 }
  0xe9   :  { %157 = vrot.lane.b32.xlu0 %v155_v11, %s859_s1  ;;  %v53_v11 = vld [vmem:[#allocation2 + $0x130] sm:$0xff] }
 0x15b   :  { %v158_v12 = vpop.permute.xlu0 %157 }
 0x15c   :  { %v161_v13 = vsel %vm160_vm4, %v154_v10, %v158_v12  ;;  %v46_v12 = vld [vmem:[#allocation2 + $0xf8] sm:$0xff] }
 0x15d   :  { %v163_v14 = vsel %vm162_vm5, %v161_v13, 0.0  ;;  %v52_v13 = vld [vmem:[#allocation2 + $0x128] sm:$0xff] }
 0x15e   :  { %v164_v15 = vrot.slane %v163_v14, 4 }
 0x160   :  { %v165_v16 = vadd.f32 %v164_v15, %v163_v14  ;;  %v45_v14 = vld [vmem:[#allocation2 + $0xf0] sm:$0xff]  ;;  %v48_v15 = vld [vmem:[#allocation2 + $0x108] sm:$0xff] }
 0x162   :  { %v166_v17 = vrot.slane %v165_v16, 2 }
 0x164   :  { %v167_v18 = vadd.f32 %v166_v17, %v165_v16  ;;  %v41_v16 = vld [vmem:[#allocation2 + $0xd0] sm:$0xff]  ;;  %v47_v17 = vld [vmem:[#allocation2 + $0x100] sm:$0xff] }
 0x166   :  { %v168_v19 = vrot.slane %v167_v18, 1 }
 0x168   :  { %v169_v20 = vadd.f32 %v168_v19, %v167_v18  ;;  %v40_v18 = vld [vmem:[#allocation2 + $0xc8] sm:$0xff]  ;;  %v43_v19 = vld [vmem:[#allocation2 + $0xe0] sm:$0xff] }
 0x16a   :  { %v170_v21 = vmul.f32 0.125, %v169_v20  ;;  %v42_v20 = vld [vmem:[#allocation2 + $0xd8] sm:$0xff] }
 0x16c   :  { %v171_v22 = vmul.f32 %v170_v21, %v170_v21 }
 0x16e   :  { %173 = vrot.lane.b32.xlu0 %v171_v22, %s859_s1 }
 0x1e0   :  { %v174_v23 = vpop.permute.xlu0 %173 }
 0x1e1   :  { %v176_v24 = vsub.f32 %v170_v21, %v174_v23  ;;  %v32_v23 = vld [vmem:[%s969_s0] sm:$0xff]  ;;  %s861_s0 = smov 120  }
 0x1e3   :  { %v177_v25 = vadd.f32 1e-05, %v176_v24 }
 0x1e5   :  { %784 = vrsqrt.f32 %v177_v25 }
 0x1f2   :  { %v785_v33 = vpop.eup %784 }
 0x1f3   :  { %189 = vrot.lane.b32.xlu1 %v785_v33, %s860_s25  ;;  %v182_v34 = vrot.slane %v785_v33, %v912_v32  ;;  %v64_v33 = vld [vmem:[#allocation2 + $0x188] sm:$0xf] }
 0x1f7   :  { %184 = vrot.lane.b32.xlu1 %v182_v34, %s860_s25 }
 0x265   :  { %v190_v35 = vpop.permute.xlu1 %189 }
 0x266   :  { %v192_v36 = vmul.f32 %v190_v35, %v170_v21  ;;  %v59_v35 = vld [vmem:[#allocation2 + $0x160] sm:$0xff] }
 0x268   :  { %v196_v38 = vrot.slane %v192_v36, %v912_v32  ;;  %v49_v36 = vld [vmem:[#allocation2 + $0x110] sm:$0xff] }
 0x269   :  { %v185_v37 = vpop.permute.xlu1 %184 }
 0x26a   :  { %v187_v39 = vmul.f32 %v185_v37, %v154_v10  ;;  %v50_v10 = vld [vmem:[#allocation2 + $0x118] sm:$0xff]  ;;  %v44_v37 = vld [vmem:[#allocation2 + $0xe8] sm:$0xff] }
 0x26b   :  { %377 = vmatpush1.msra.mxu0 %v50_v10 }
 0x26c   :  { %v197_v40 = vsub.f32 %v187_v39, %v196_v38  ;;  %378 = vmatprep.subr.mxu0 %v46_v12 }
 0x26d   :  { %379 = vmatpush1.msra.mxu0 %v45_v14 }
 0x26e   :  { %757 = vmatmul.mubr.msk.f32.vlgmr.msra.gmra.mxu1 %vm160_vm4, %v197_v40  ;;  %380 = vmatprep.subr.mxu0 %v41_v16 }
 0x26f   :  { %485 = vmatprep.mubr.f32.mxu1 %v857_v0  ;;  %726 = vmatpush1.msk.msra.mxu1 %vm334_vm7, %v62_v2 }
 0x270   :  { %445 = vmatprep.subr.mxu1 %v58_v7  ;;  %381 = vmatpush1.msra.mxu0 %v40_v18 }
 0x271   :  { %446 = vmatpush1.msra.mxu1 %v57_v9  ;;  %759 = vmatprep.subr.mxu0 %v857_v0 }
 0x272   :  { %447 = vmatprep.subr.mxu1 %v53_v11 }
 0x273   :  { %448 = vmatpush1.msra.mxu1 %v52_v13 }
 0x274   :  { %449 = vmatprep.subr.mxu1 %v48_v15 }
 0x275   :  { %450 = vmatpush1.msra.mxu1 %v47_v17 }
 0x276   :  { %451 = vmatprep.subr.mxu1 %v43_v19 }
 0x277   :  { %452 = vmatpush1.msra.mxu1 %v42_v20 }
 0x32e   :  { %v273_v42 = vpop.f32.mrf.mxu1 }
 0x32f   :  { %v274_v43 = vadd.f32 %v719_v41, %v273_v42 }
 0x330   :  { %v758_v44 = vpop.f32.mrf.mxu1 }
 0x331   :  { %v278_v45 = vmul.f32 1.442695, %v274_v43  ;;  %vm277_vm6 = vcmp.gt.f32.partialorder %v274_v43, 0.0 }
 0x333   :  { %786 = vpow2.f32 %v278_v45 }
 0x340   :  { %v787_v46 = vpop.eup %786 }
 0x341   :  { %v721_v47 = vadd.f32 -1.0, %v787_v46 }
 0x343   :  { %v923_v48 = vsel %vm277_vm6, %v274_v43, %v721_v47 }
 0x344   :  { %v282_v49 = vmul.f32 %v923_v48, %v923_v48 }
 0x346   :  { %284 = vrot.lane.b32.xlu0 %v282_v49, %s859_s1 }
 0x3b8   :  { %v285_v50 = vpop.permute.xlu0 %284 }
 0x3b9   :  { %v287_v51 = vsel %vm160_vm4, %v923_v48, %v285_v50 }
 0x3ba   :  { %v288_v52 = vsel %vm162_vm5, %v287_v51, 0.0 }
 0x3bb   :  { %v289_v53 = vrot.slane %v288_v52, 4 }
 0x3bd   :  { %v290_v54 = vadd.f32 %v289_v53, %v288_v52 }
 0x3bf   :  { %v291_v55 = vrot.slane %v290_v54, 2 }
 0x3c1   :  { %v292_v56 = vadd.f32 %v291_v55, %v290_v54 }
 0x3c3   :  { %v293_v57 = vrot.slane %v292_v56, 1 }
 0x3c5   :  { %v294_v58 = vadd.f32 %v293_v57, %v292_v56 }
 0x3c7   :  { %v295_v59 = vmul.f32 0.125, %v294_v58 }
 0x3c9   :  { %v296_v60 = vmul.f32 %v295_v59, %v295_v59 }
 0x3cb   :  { %298 = vrot.lane.b32.xlu1 %v296_v60, %s859_s1 }
 0x43d   :  { %v299_v3 = vpop.permute.xlu1 %298 }
 0x43e   :  { %v301_v4 = vsub.f32 %v295_v59, %v299_v3 }
 0x440   :  { %v302_v5 = vadd.f32 1e-05, %v301_v4 }
 0x442   :  { %788 = vrsqrt.f32 %v302_v5 }
 0x44f   :  { %v789_v21 = vpop.eup %788 }
 0x450   :  { %314 = vrot.lane.b32.xlu0 %v789_v21, %s860_s25  ;;  %v307_v22 = vrot.slane %v789_v21, %v912_v32 }
 0x452   :  { %309 = vrot.lane.b32.xlu1 %v307_v22, %s860_s25 }
 0x454   :  { %324 = vrot.lane.b32.xlu0 %v32_v23, %s859_s1 }
 0x4c2   :  { %v315_v24 = vpop.permute.xlu0 %314 }
 0x4c3   :  { %v317_v25 = vmul.f32 %v315_v24, %v295_v59 }
 0x4c4   :  { %v310_v26 = vpop.permute.xlu1 %309 }
 0x4c5   :  { %v321_v27 = vrot.slane %v317_v25, %v912_v32  ;;  %v312_v28 = vmul.f32 %v310_v26, %v923_v48  ;;  %v54_v32 = vld [vmem:[#allocation2 + $0x138] sm:$0xff] }
 0x4c6   :  { %v325_v29 = vpop.permute.xlu0 %324 }
 0x4c7   :  { %v322_v30 = vsub.f32 %v312_v28, %v321_v27 }
 0x4c9   :  { %v327_v31 = vsel %vm160_vm4, %v322_v30, %v325_v29 }
 0x4ca   :  { %v329_v34 = vsel %vm328_vm8, %v327_v31, 1.0 }
 0x4cb   :  { %724 = vmatmul.mubr.msk.f32.vlgmr.msra.gmra.mxu0 %vm330_vm9, %v329_v34  ;;  %727 = vmatmul.mubr.msk.f32.vlgmr.msra.gmra.mxu1 %vm330_vm9, %v329_v34 }
 0x4cc   :  { %760 = vmatpush3.msk.msra.mxu0 %vm334_vm7, %v64_v33  ;;  %769 = vmatprep.mubr.msk.f32.mxu0 %vm858_vm0, %v857_v0 }
 0x4cd   :  { %761 = vmatprep.subr.mxu0 %v857_v0 }
 0x4ce   :  { %762 = vmatpush3.msra.mxu0 %v59_v35 }
 0x4cf   :  { %763 = vmatprep.subr.mxu0 %v857_v0 }
 0x4d0   :  { %764 = vmatpush3.msra.mxu0 %v54_v32 }
 0x4d1   :  { %765 = vmatprep.subr.mxu0 %v857_v0 }
 0x4d2   :  { %766 = vmatpush3.msra.mxu0 %v49_v36 }
 0x4d3   :  { %767 = vmatprep.subr.mxu0 %v857_v0 }
 0x4d4   :  { %768 = vmatpush3.msra.mxu0 %v44_v37 }
 0x4d5   :  { %770 = vmatmul.mubr.msk.f32.vlgmr.msra.gmra.mxu0 %vm330_vm9, %v329_v34 }
 0x58b   :  { %v487_v38 = vpop.f32.mrf.mxu1  ;;  %v957_v40 = vpop.f32.mrf.mxu0 }
 0x58c   :  { %v562_v39 = vmul.f32 1.442695, %v487_v38  ;;  %v664_v58 = vsel %vm663_vm10, %v957_v40, -inf }
 0x58d   :  { %v418_v41 = vpop.f32.mrf.mxu0  ;;  %v489_v47 = vpop.f32.mrf.mxu1 }
 0x58e   :  { %790 = vpow2.f32 %v562_v39 }
 0x595   :  { %v558_v42 = vpop.f32.mrf.mxu0 }
 0x597   :  { %v771_v43 = vpop.f32.mrf.mxu0 }
 0x59b   :  { %v791_v44 = vpop.eup %790 }
 0x59c   :  { %v564_v45 = vadd.f32 1e-05, %v791_v44 }
 0x59e   :  { %792 = vrcp.f32 %v564_v45 }
 0x59f   :  { %794 = vlog2.f32 %v564_v45 }
 0x5ab   :  { %v793_v46 = vpop.eup %792 }
 0x5ac   :  { %v598_v48 = vmul.f32 %v793_v46, %v489_v47  ;;  %v599_v50 = vmul.f32 %v793_v46, %v558_v42  ;;  %v567_v51 = vmul.f32 %v793_v46, %v418_v41  ;;  %v795_v55 = vpop.eup %794 }
 0x5ad   :  { %v646_v57 = vmul.f32 0.6931472, %v795_v55 }
 0x5ae   :  { %v600_v49 = vmul.f32 %v598_v48, %v489_v47  ;;  %v611_v0 = vmul.f32 %v599_v50, %v489_v47  ;;  %v621_v52 = vmul.f32 %v599_v50, %v558_v42  ;;  %v578_v53 = vmul.f32 %v567_v51, %v489_v47 }
 0x5af   :  { %v588_v54 = vmul.f32 %v567_v51, %v558_v42  ;;  %v568_v56 = vmul.f32 %v567_v51, %v418_v41 }
 0x5b0   :  { %606 = vrot.lane.b32.xlu0 %v600_v49, %s861_s0  ;;  %602 = vrot.lane.b32.xlu1 %v600_v49, %s862_s29 }
 0x5b4   :  { %617 = vrot.lane.b32.xlu0 %v611_v0, %s861_s0  ;;  %613 = vrot.lane.b32.xlu1 %v611_v0, %s862_s29 }
 0x5b8   :  { %627 = vrot.lane.b32.xlu0 %v621_v52, %s861_s0  ;;  %623 = vrot.lane.b32.xlu1 %v621_v52, %s862_s29 }
 0x5bc   :  { %584 = vrot.lane.b32.xlu0 %v578_v53, %s861_s0  ;;  %580 = vrot.lane.b32.xlu1 %v578_v53, %s862_s29 }
 0x5c0   :  { %594 = vrot.lane.b32.xlu0 %v588_v54, %s861_s0  ;;  %590 = vrot.lane.b32.xlu1 %v588_v54, %s862_s29 }
 0x5c4   :  { %570 = vrot.lane.b32.xlu0 %v568_v56, %s862_s29  ;;  %648 = vrot.lane.b32.xlu1 %v646_v57, %s862_s29 }
 0x5c8   :  { %574 = vrot.lane.b32.xlu0 %v568_v56, %s861_s0  ;;  %652 = vrot.lane.b32.xlu1 %v646_v57, %s861_s0 }
 0x5ec   :  { %665 = vmax.xlane.f32.xlu1 %v664_v58 }
 0x622   :  { %v603_v59 = vpop.permute.xlu1 %602  ;;  %v607_v61 = vpop.permute.xlu0 %606 }
 0x623   :  { %v605_v60 = vadd.f32 %v603_v59, %v600_v49 }
 0x625   :  { %v609_v62 = vadd.f32 %v607_v61, %v605_v60 }
 0x626   :  { %v614_v1 = vpop.permute.xlu1 %613  ;;  %v618_v2 = vpop.permute.xlu0 %617 }
 0x627   :  { %v610_v63 = vadd.f32 1.0, %v609_v62  ;;  %v616_v4 = vadd.f32 %v614_v1, %v611_v0 }
 0x629   :  { %796 = vrsqrt.f32 %v610_v63  ;;  %v620_v7 = vadd.f32 %v618_v2, %v616_v4 }
 0x62a   :  { %v624_v3 = vpop.permute.xlu1 %623  ;;  %v628_v6 = vpop.permute.xlu0 %627 }
 0x62b   :  { %v626_v5 = vadd.f32 %v624_v3, %v621_v52 }
 0x62d   :  { %v630_v8 = vadd.f32 %v628_v6, %v626_v5 }
 0x62e   :  { %v581_v11 = vpop.permute.xlu1 %580  ;;  %v585_v14 = vpop.permute.xlu0 %584 }
 0x62f   :  { %v631_v13 = vadd.f32 1.0, %v630_v8  ;;  %v583_v16 = vadd.f32 %v581_v11, %v578_v53 }
 0x631   :  { %v587_v19 = vadd.f32 %v585_v14, %v583_v16 }
 0x632   :  { %v591_v18 = vpop.permute.xlu1 %590  ;;  %v595_v20 = vpop.permute.xlu0 %594 }
 0x633   :  { %v593_v22 = vadd.f32 %v591_v18, %v588_v54 }
 0x635   :  { %v597_v26 = vadd.f32 %v595_v20, %v593_v22 }
 0x636   :  { %v797_v9 = vpop.eup %796  ;;  %v649_v23 = vpop.permute.xlu1 %648 }
 0x637   :  { %v633_v10 = vmul.f32 %v797_v9, %v620_v7  ;;  %v637_v21 = vmul.f32 %v797_v9, %v587_v19  ;;  %v571_v25 = vpop.permute.xlu0 %570  ;;  %v651_v31 = vadd.f32 %v649_v23, %v646_v57 }
 0x638   :  { %v573_v34 = vadd.f32 %v571_v25, %v568_v56 }
 0x639   :  { %v634_v12 = vmul.f32 %v633_v10, %v633_v10  ;;  %v638_v24 = vmul.f32 %v637_v21, %v633_v10  ;;  %v641_v32 = vmul.f32 %v637_v21, %v637_v21 }
 0x63a   :  { %v653_v29 = vpop.permute.xlu1 %652 }
 0x63b   :  { %v635_v15 = vsub.f32 %v631_v13, %v634_v12  ;;  %v639_v27 = vsub.f32 %v597_v26, %v638_v24  ;;  %v575_v35 = vpop.permute.xlu0 %574  ;;  %v655_v38 = vadd.f32 %v653_v29, %v651_v31 }
 0x63c   :  { %v577_v39 = vadd.f32 %v575_v35, %v573_v34 }
 0x63d   :  { %798 = vrsqrt.f32 %v635_v15  ;;  %v656_v17 = vmul.f32 %v635_v15, %v610_v63 }
 0x63f   :  { %800 = vlog2.f32 %v656_v17 }
 0x64a   :  { %v799_v28 = vpop.eup %798 }
 0x64b   :  { %v640_v30 = vmul.f32 %v799_v28, %v639_v27 }
 0x64c   :  { %v801_v33 = vpop.eup %800 }
 0x64d   :  { %v642_v36 = vmul.f32 %v640_v30, %v640_v30  ;;  %v658_v37 = vmul.f32 0.6931472, %v801_v33 }
 0x64f   :  { %v643_v41 = vadd.f32 %v642_v36, %v641_v32  ;;  %v659_v42 = vadd.f32 %v658_v37, %v655_v38 }
 0x651   :  { %v644_v43 = vsub.f32 %v577_v39, %v643_v41  ;;  %v660_v44 = vadd.f32 5.5136313, %v659_v42 }
 0x653   :  { %v661_v45 = vadd.f32 %v660_v44, %v644_v43 }
 0x655   :  { %v662_v46 = vmul.f32 -0.5, %v661_v45 }
 0x657   :  { %v676_v47 = vadd.f32 %v662_v46, %v957_v40 }
 0x659   :  { %v677_v48 = vsel %vm663_vm10, %v676_v47, -inf }
 0x65a   :  { %678 = vmax.xlane.f32.xlu0 %v677_v48 }
 0x675   :  { %v666_v49 = vpop.xlane.xlu1 %665 }
 0x676   :  { %v667_v50 = vsub.f32 %v957_v40, %v666_v49 }
 0x678   :  { %v668_v0 = vmul.f32 1.442695, %v667_v50 }
 0x67a   :  { %802 = vpow2.f32 %v668_v0 }
 0x687   :  { %v803_v51 = vpop.eup %802 }
 0x688   :  { %v670_v52 = vsel %vm663_vm10, %v803_v51, 0.0 }
 0x689   :  { %671 = vadd.xlane.f32.xlu0 %v670_v52 }
 0x6e3   :  { %v679_v53 = vpop.xlane.xlu0 %678 }
 0x6e4   :  { %v680_v54 = vsub.f32 %v676_v47, %v679_v53 }
 0x6e6   :  { %v681_v55 = vmul.f32 1.442695, %v680_v54 }
 0x6e8   :  { %804 = vpow2.f32 %v681_v55 }
 0x6f5   :  { %v805_v56 = vpop.eup %804 }
 0x6f6   :  { %v683_v57 = vsel %vm663_vm10, %v805_v56, 0.0 }
 0x6f7   :  { %684 = vadd.xlane.f32.xlu1 %v683_v57 }
 0x712   :  { %v672_v58 = vpop.xlane.xlu0 %671 }
 0x713   :  { %806 = vlog2.f32 %v672_v58 }
 0x720   :  { %v807_v60 = vpop.eup %806 }
 0x721   :  { %v674_v40 = vmul.f32 0.6931472, %v807_v60 }
 0x723   :  { %v675_v63 = vadd.f32 %v674_v40, %v666_v49 }
 0x780   :  { %v685_v59 = vpop.xlane.xlu1 %684 }
 0x781   :  { %808 = vlog2.f32 %v685_v59 }
 0x78e   :  { %v809_v61 = vpop.eup %808 }
 0x78f   :  { %v687_v62 = vmul.f32 0.6931472, %v809_v61 }
 0x791   :  { %v688_v1 = vadd.f32 %v687_v62, %v679_v53 }
 0x793   :  { %v689_v2 = vsub.f32 %v688_v1, %v675_v63 }
 0x795   :  { %v690_v3 = vrot.slane %v689_v2, 4 }
 0x797   :  { %v691_v4 = vadd.f32 %v690_v3, %v689_v2 }
 0x799   :  { %v692_v5 = vrot.slane %v691_v4, 2 }
 0x79b   :  { %v693_v6 = vadd.f32 %v692_v5, %v691_v4 }
 0x79d   :  { %v694_v7 = vrot.slane %v693_v6, 1 }
 0x79f   :  { %v695_v8 = vadd.f32 %v694_v7, %v693_v6 }
 0x7a1   :  { %v696_v9 = vsub.f32 0.0, %v695_v8 }
 0x7a3   :  { %v697_v10 = vmul.f32 0.125, %v696_v9 }
 0x7a5   :  { %699 = vst.msk [vmem:[#allocation5] sm:$0x1] %vm698_vm11, %v697_v10 }
 0x7a6   :  { %841 = shalt.err (!%p838_p9)
}
 0x7a7   :  { %709 = dma.vmem_to_hbm [thread:$0]  %s707_s5, 16, %s973_s4, [#allocation4]  }
 0x7a8   :  { %852 = dma.done.wait [#allocation4], 16  }
 0x7a9   :  { %853 = vsyncadd [#allocation4], 4294967280 }
 0x7aa   :  { %713 = vsyncpa [#allocation3], 1 }
 0x7ab   :  { %714 = vsyncpa [#allocation4], 1 }

</bundles_post_ra>
